<compile_context>
chip_gen: v5e
topology: v5e:2x2
jax: 0.10.0
libtpu: 0.0.40
codegen_flags: <defaults>
</compile_context>

<pallas_src>
import functools

import jax
import jax.numpy as jnp
from jax import lax
from jax.experimental import pallas as pl
from jax.experimental.pallas import tpu as pltpu


# ---------------------------------------------------------------------------
# Activations (subset of create_act used by CoSim-GNN).
# ---------------------------------------------------------------------------
_ACTS = {
    "relu": lambda x: jnp.maximum(x, 0.0),
    "identity": lambda x: x,
    "sigmoid": jax.nn.sigmoid,
    "tanh": jnp.tanh,
}

_VMEM_BUDGET = 24 * 1024 * 1024   # target working-set (double-buffered tiles)
_VMEM_LIMIT = 32 * 1024 * 1024    # explicit scoped-VMEM limit: safe on v5e/v6e/v7x
_TILE_CAP = 256                   # output tile cap: fills 256x256 MXU on v6e/v7x
_TK_MAX = 2048


def _round_up(x, m):
    return ((x + m - 1) // m) * m


def _cdiv(a, b):
    return -(-a // b)


def _dot_nt(a, b):
    """(tm, tk) x (tn, tk) -> (tm, tn), contracting the last axis of both."""
    return lax.dot_general(
        a, b,
        dimension_numbers=(((1,), (1,)), ((), ())),
        preferred_element_type=jnp.float32,
    )


def _make_kernels(act):
    """Build (single-reduction-step, multi-step) kernel bodies for `act`."""

    def direct_kernel(x1_ref, x2_ref, o_ref):
        # Whole reduction in one step: no scratch accumulator needed.
        o_ref[...] = act(_dot_nt(x1_ref[...], x2_ref[...])).astype(o_ref.dtype)

    def acc_kernel(x1_ref, x2_ref, o_ref, acc_ref):
        # Reduction axis is always the last (4th) grid axis on this path.
        k = pl.program_id(3)

        @pl.when(k == 0)
        def _init():
            acc_ref[...] = jnp.zeros_like(acc_ref)

        acc_ref[...] += _dot_nt(x1_ref[...], x2_ref[...])

        @pl.when(k == pl.num_programs(3) - 1)
        def _finalize():
            o_ref[...] = act(acc_ref[...]).astype(o_ref.dtype)

    return direct_kernel, acc_kernel


def _select_tiles(n1, n2, d, in_itemsize, out_itemsize, tile_cap, tk_max):
    """Pick (tm, tn, tk) and padded extents under the VMEM working-set budget."""
    # Rows: small graphs pad only to the sublane multiple (8); large graphs tile.
    if n1 <= tile_cap:
        tm = _round_up(max(n1, 8), 8)
        n1p = tm
    else:
        tm = tile_cap
        n1p = _round_up(n1, tm)
    # Cols: keep multiples of 128 for lane-dense output stores.
    if n2 <= tile_cap:
        tn = _round_up(max(n2, 128), 128)
        n2p = tn
    else:
        tn = tile_cap
        n2p = _round_up(n2, tn)

    dp0 = _round_up(d, 128)
    # Take as much of D per reduction step as fits the budget (fewer acc RMW
    # iterations / per-step overheads; HBM traffic unchanged).
    fixed = 2 * tm * tn * out_itemsize + tm * tn * 4          # out (2-buf) + f32 acc
    per_k = 2 * (tm + tn) * in_itemsize                       # inputs, double-buffered
    tk_budget = max(128, ((_VMEM_BUDGET - fixed) // per_k) // 128 * 128)
    tk_cap = max(128, min(tk_max, tk_budget))
    nk = _cdiv(dp0, tk_cap)
    tk = _round_up(_cdiv(dp0, nk), 128)
    dp = nk * tk
    return tm, tn, tk, n1p, n2p, dp, nk


def _make_index_maps(order, has_k):
    """Index maps aware of the (megacore-friendly) parallel-axis ordering."""

    def build(block_fn):
        def idx_map(*args):
            vals = [0, 0, 0]                   # logical (batch, i, j)
            for pos, ax in enumerate(order):
                vals[ax] = args[pos]
            k = args[3] if has_k else 0
            return block_fn(vals[0], vals[1], vals[2], k)
        return idx_map

    x1_map = build(lambda bb, i, j, k: (bb, i, k))
    x2_map = build(lambda bb, i, j, k: (bb, j, k))
    out_map = build(lambda bb, i, j, k: (bb, i, j))
    return x1_map, x2_map, out_map


# ---------------------------------------------------------------------------
# Batched Pallas call: x1 (B, N1, D), x2 (B, N2, D) -> act(x1 @ x2^T) (B, N1, N2)
# ---------------------------------------------------------------------------
@functools.partial(
    jax.jit,
    static_argnames=("inneract", "compute_dtype", "out_dtype", "tile_cap", "tk_max"))
def _mne_batched(x1, x2, *, inneract="relu", compute_dtype=None, out_dtype=None,
                 tile_cap=_TILE_CAP, tk_max=_TK_MAX):
    assert x1.ndim == 3 and x2.ndim == 3
    b, n1, d = x1.shape
    b2, n2, d2 = x2.shape
    assert b == b2, "batch dims must match"
    assert d == d2, "feature dims must match"

    out_dt = jnp.dtype(out_dtype) if out_dtype is not None else x1.dtype
    if compute_dtype is not None:
        # Opt-in (bf16 on v6e/v7x): accumulation stays f32; result will not
        # bit-match the f32 PyTorch reference.
        x1 = x1.astype(compute_dtype)
        x2 = x2.astype(compute_dtype)

    in_isz = x1.dtype.itemsize
    out_isz = out_dt.itemsize
    tm, tn, tk, n1p, n2p, dp, nk = _select_tiles(
        n1, n2, d, in_isz, out_isz, tile_cap, tk_max)

    # Zero-padding is exact: padded feature columns contribute 0 to the dot,
    # padded rows/cols are sliced off by the caller.  Skip pad when aligned.
    if (n1p, dp) != (n1, d):
        x1 = jnp.pad(x1, ((0, 0), (0, n1p - n1), (0, dp - d)))
    if (n2p, dp) != (n2, d):
        x2 = jnp.pad(x2, ((0, 0), (0, n2p - n2), (0, dp - d)))

    ni = n1p // tm
    nj = n2p // tn
    has_k = nk > 1

    # Megacore: put the largest parallel extent first (reduction axis stays last).
    extents = (b, ni, nj)
    order = tuple(sorted(range(3), key=lambda a: -extents[a]))
    grid = tuple(extents[ax] for ax in order) + ((nk,) if has_k else ())
    dims = ("parallel",) * 3 + (("arbitrary",) if has_k else ())

    x1_map, x2_map, out_map = _make_index_maps(order, has_k)
    direct_kernel, acc_kernel = _make_kernels(_ACTS[inneract])

    if has_k:
        kernel = acc_kernel
        in_specs = [
            pl.BlockSpec((None, tm, tk), x1_map),
            pl.BlockSpec((None, tn, tk), x2_map),
        ]
        scratch = [pltpu.VMEM((tm, tn), jnp.float32)]
    else:
        # Whole reduction in one step: scratch-free kernel, 3-D grid.
        kernel = direct_kernel
        in_specs = [
            pl.BlockSpec((None, tm, dp), x1_map),
            pl.BlockSpec((None, tn, dp), x2_map),
        ]
        scratch = []
    out_specs = pl.BlockSpec((None, tm, tn), out_map)

    cost = pl.CostEstimate(
        flops=2 * b * n1p * n2p * dp,
        transcendentals=0,
        bytes_accessed=(b * (n1p + n2p) * dp * in_isz
                        + b * n1p * n2p * out_isz),
    )

    out = pl.pallas_call(
        kernel,
        out_shape=jax.ShapeDtypeStruct((b, n1p, n2p), out_dt),
        grid_spec=pltpu.PrefetchScalarGridSpec(
            num_scalar_prefetch=0,
            grid=grid,
            in_specs=in_specs,
            out_specs=out_specs,
            scratch_shapes=scratch,
        ),
        compiler_params=pltpu.CompilerParams(
            dimension_semantics=dims,
            vmem_limit_bytes=_VMEM_LIMIT,
        ),
        cost_estimate=cost,
    )(x1, x2)
    return out


# ---------------------------------------------------------------------------
# Module-level forward (mirrors MNE.forward)
# ---------------------------------------------------------------------------
def _pad2(x, rows, cols):
    r, c = x.shape
    if (r, c) == (rows, cols):
        return x
    return jnp.pad(x, ((0, rows - r), (0, cols - c)))


def _bucket_key(n1, n2, d, tile_cap=_TILE_CAP):
    k1 = _round_up(max(n1, 8), 8) if n1 <= tile_cap else _round_up(n1, tile_cap)
    k2 = _round_up(max(n2, 128), 128) if n2 <= tile_cap else _round_up(n2, tile_cap)
    return (k1, k2, _round_up(d, 128))


def mne_forward(inputs, *, inneract="relu", compute_dtype=None, out_dtype=None):
    """Mirror of MNE.forward: accepts a pair [x1, x2] or a list of pairs."""
    assert isinstance(inputs, list) and inputs

    if isinstance(inputs[0], (list, tuple)):
        pairs = inputs
        for p in pairs:
            assert len(p) == 2
            assert p[0].shape[1] == p[1].shape[1], \
                "feature dims must match within a pair"

        # Bucket pairs by padded tile shape so a heterogeneous batch is not
        # all padded to the global max; one batched pallas_call per bucket.
        buckets = {}
        for idx, (a, c) in enumerate(pairs):
            key = _bucket_key(a.shape[0], c.shape[0], a.shape[1])
            buckets.setdefault(key, []).append(idx)

        results = [None] * len(pairs)
        for idxs in buckets.values():
            n1b = max(pairs[i][0].shape[0] for i in idxs)
            n2b = max(pairs[i][1].shape[0] for i in idxs)
            db = max(pairs[i][0].shape[1] for i in idxs)
            x1 = jnp.stack([_pad2(pairs[i][0], n1b, db) for i in idxs])
            x2 = jnp.stack([_pad2(pairs[i][1], n2b, db) for i in idxs])
            out = _mne_batched(x1, x2, inneract=inneract,
                               compute_dtype=compute_dtype, out_dtype=out_dtype)
            for slot, i in enumerate(idxs):
                results[i] = out[slot, :pairs[i][0].shape[0], :pairs[i][1].shape[0]]
        return results

    assert len(inputs) == 2
    x1, x2 = inputs
    assert x1.shape[1] == x2.shape[1], "feature dims must match"
    out = _mne_batched(x1[None], x2[None], inneract=inneract,
                       compute_dtype=compute_dtype, out_dtype=out_dtype)
    return out[0, :x1.shape[0], :x2.shape[0]]


if __name__ == "__main__":
    key = jax.random.PRNGKey(0)
    k1, k2, k3, k4, k5, k6 = jax.random.split(key, 6)

    # Small shapes consistent with the module: node-feature matrices sharing
    # the feature dim (input_dim = 128).
    input_dim = 128
    x1 = jax.random.normal(k1, (64, input_dim), dtype=jnp.float32)
    x2 = jax.random.normal(k2, (48, input_dim), dtype=jnp.float32)

    # Single-pair path (direct / scratch-free kernel, tm=64, tn=128).
    out = jax.block_until_ready(mne_forward([x1, x2]))
    ref = jnp.maximum(x1 @ x2.T, 0.0)
    assert out.shape == (64, 48)
    assert jnp.allclose(out, ref, atol=1e-5, rtol=1e-5)

    # List-of-pairs path with heterogeneous sizes (exercises bucketing).
    y1 = jax.random.normal(k3, (32, input_dim), dtype=jnp.float32)
    y2 = jax.random.normal(k4, (32, input_dim), dtype=jnp.float32)
    z1 = jax.random.normal(k5, (60, input_dim), dtype=jnp.float32)
    z2 = jax.random.normal(k6, (40, input_dim), dtype=jnp.float32)
    outs = mne_forward([[x1, x2], [y1, y2], [z1, z2]])
    outs = jax.block_until_ready(outs)
    refs = [jnp.maximum(x1 @ x2.T, 0.0),
            jnp.maximum(y1 @ y2.T, 0.0),
            jnp.maximum(z1 @ z2.T, 0.0)]
    assert outs[0].shape == (64, 48)
    assert outs[1].shape == (32, 32)
    assert outs[2].shape == (60, 40)
    for o, r in zip(outs, refs):
        assert jnp.allclose(o, r, atol=1e-5, rtol=1e-5)

    # Exercise the multi-step-reduction (accumulator) path: D large enough
    # that it no longer fits a single reduction tile (tk_max = 2048).
    w1 = jax.random.normal(k1, (200, 3000), dtype=jnp.float32)
    w2 = jax.random.normal(k2, (130, 3000), dtype=jnp.float32)
    outw = jax.block_until_ready(mne_forward([w1, w2]))
    refw = jnp.maximum(w1 @ w2.T, 0.0)
    assert outw.shape == (200, 130)
    assert jnp.allclose(outw, refw, atol=1e-3, rtol=1e-4)

    print("KERNEL_OK")
</pallas_src>

<mosaic_0001>
module attributes {stable_mosaic.version = 11 : i64} {
  func.func @direct_kernel(%arg0: i32, %arg1: i32, %arg2: i32, %arg3: memref<1x64x128xf32, #tpu.memory_space<vmem>>, %arg4: memref<1x128x128xf32, #tpu.memory_space<vmem>>, %arg5: memref<1x64x128xf32, #tpu.memory_space<vmem>>) attributes {dimension_semantics = [#tpu.dimension_semantics<parallel>, #tpu.dimension_semantics<parallel>, #tpu.dimension_semantics<parallel>], iteration_bounds = array<i64: 1, 1, 1>, scalar_prefetch = 0 : i64, scratch_operands = 0 : i64, tpu.core_type = #tpu.core_type<tc>, window_params = [{transform_indices = @transform_0, window_bounds = array<i64: 1, 64, 128>}, {transform_indices = @transform_1, window_bounds = array<i64: 1, 128, 128>}, {transform_indices = @transform_2, window_bounds = array<i64: 1, 64, 128>}]} {
    %c0 = arith.constant 0 : index
    %c0_0 = arith.constant 0 : index
    %c0_1 = arith.constant 0 : index
    %0 = vector.load %arg3[%c0, %c0_0, %c0_1] : memref<1x64x128xf32, #tpu.memory_space<vmem>>, vector<1x64x128xf32>
    %1 = vector.shape_cast %0 : vector<1x64x128xf32> to vector<64x128xf32>
    %c0_2 = arith.constant 0 : index
    %c0_3 = arith.constant 0 : index
    %c0_4 = arith.constant 0 : index
    %2 = vector.load %arg4[%c0_2, %c0_3, %c0_4] : memref<1x128x128xf32, #tpu.memory_space<vmem>>, vector<1x128x128xf32>
    %3 = vector.shape_cast %2 : vector<1x128x128xf32> to vector<128x128xf32>
    %cst = arith.constant dense<0.000000e+00> : vector<64x128xf32>
    %4 = tpu.matmul %1, %3, %cst {dimension_numbers = #tpu.dot_dimension_numbers<[1], [1], [0], [0], [0, 0, 1, 0], [], []>} : vector<64x128xf32>, vector<128x128xf32>, vector<64x128xf32> -> vector<64x128xf32>
    %cst_5 = arith.constant 0.000000e+00 : f32
    %5 = vector.broadcast %cst_5 : f32 to vector<64x128xf32>
    %6 = arith.maximumf %4, %5 : vector<64x128xf32>
    %c0_6 = arith.constant 0 : index
    %c0_7 = arith.constant 0 : index
    %c0_8 = arith.constant 0 : index
    %7 = vector.load %arg5[%c0_6, %c0_7, %c0_8] : memref<1x64x128xf32, #tpu.memory_space<vmem>>, vector<1x64x128xf32>
    %8 = vector.shape_cast %7 : vector<1x64x128xf32> to vector<64x128xf32>
    %9 = vector.shape_cast %6 : vector<64x128xf32> to vector<1x64x128xf32>
    tpu.vector_store %arg5[%c0_6, %c0_7, %c0_8], %9 {strides = array<i32>} : memref<1x64x128xf32, #tpu.memory_space<vmem>>, vector<1x64x128xf32>,
    return
  }
  func.func @transform_0(%arg0: i32, %arg1: i32, %arg2: i32) -> (i32, i32, i32) {
    %c0_i32 = arith.constant 0 : i32
    %c0_i32_0 = arith.constant 0 : i32
    return %arg0, %arg1, %c0_i32 : i32, i32, i32
  }
  func.func @transform_1(%arg0: i32, %arg1: i32, %arg2: i32) -> (i32, i32, i32) {
    %c0_i32 = arith.constant 0 : i32
    %c0_i32_0 = arith.constant 0 : i32
    return %arg0, %arg2, %c0_i32 : i32, i32, i32
  }
  func.func @transform_2(%arg0: i32, %arg1: i32, %arg2: i32) -> (i32, i32, i32) {
    %c0_i32 = arith.constant 0 : i32
    return %arg0, %arg1, %arg2 : i32, i32, i32
  }
}

</mosaic_0001>

<bundles_post_ra>
// kernel: _mne_batched.1
= control target key start
LH: loop header
LB: loop body
LE: loop exit
PB: predicated region body
PF: predicated region fallthrough
CT: control target
= control target key end

     0   :  { %s281_s0 = inlined_call_operand.vmem [shape: f32[1,64,128], index: 0, kind: input, shape index: {}]   ;;  %s282_s1 = inlined_call_operand.vmem [shape: f32[1,128,128], index: 1, kind: input, shape index: {}]   ;;  %s283_s2 = inlined_call_operand.hbm [shape: f32[1,64,128], index: 2, kind: output, shape index: {}]  }
   0x1   :  { %v35_v0 = vld [vmem:[%s282_s1 + $0x78] sm:$0xff]  ;;  %v34_v1 = vld [vmem:[%s282_s1 + $0x70] sm:$0xff] }
   0x2   :  { %112 = vmatpush.xpose.msra.mxu2 %v35_v0  ;;  %113 = vmatpush.xpose.msra.mxu3 %v35_v0 }
   0x3   :  { %36 = vmatpush.xpose.msra.mxu0 %v35_v0  ;;  %111 = vmatpush.xpose.msra.mxu1 %v35_v0 }
   0x4   :  { %7 = vsyncpa [#allocation3], 0  ;;  %v33_v2 = vld [vmem:[%s282_s1 + $0x68] sm:$0xff]  ;;  %v32_v3 = vld [vmem:[%s282_s1 + $0x60] sm:$0xff]  ;;  %s99_s3 = sshll.u32 %s283_s2, 4  ;;  %s189_s4 = smov 128   ;;  %s100_s3 = int_to_ptr.hbm [resolvable:$true] %s99_s3 }
   0x5   :  { %v31_v4 = vld [vmem:[%s282_s1 + $0x58] sm:$0xff]  ;;  %v30_v5 = vld [vmem:[%s282_s1 + $0x50] sm:$0xff]  ;;  %v29_v6 = vld [vmem:[%s282_s1 + $0x48] sm:$0xff]  ;;  %s190_s5 = smov 8  }
   0x6   :  { %115 = vmatpush.xpose.msra.mxu2 %v34_v1  ;;  %116 = vmatpush.xpose.msra.mxu3 %v34_v1  ;;  %v28_v7 = vld [vmem:[%s282_s1 + $0x40] sm:$0xff]  ;;  %v27_v8 = vld [vmem:[%s282_s1 + $0x38] sm:$0xff]  ;;  %v26_v9 = vld [vmem:[%s282_s1 + $0x30] sm:$0xff] }
   0x7   :  { %37 = vmatpush.xpose.msra.mxu0 %v34_v1  ;;  %114 = vmatpush.xpose.msra.mxu1 %v34_v1  ;;  %v25_v10 = vld [vmem:[%s282_s1 + $0x28] sm:$0xff]  ;;  %v24_v11 = vld [vmem:[%s282_s1 + $0x20] sm:$0xff]  ;;  %v23_v12 = vld [vmem:[%s282_s1 + $0x18] sm:$0xff] }
   0x8   :  { %v22_v13 = vld [vmem:[%s282_s1 + $0x10] sm:$0xff]  ;;  %v21_v14 = vld [vmem:[%s282_s1 + $0x8] sm:$0xff]  ;;  %v20_v15 = vld [vmem:[%s282_s1] sm:$0xff] }
   0x9   :  { %v16_v16 = vld [vmem:[%s281_s0 + $0x20] sm:$0xff]  ;;  %v18_v17 = vld [vmem:[%s281_s0 + $0x30] sm:$0xff]  ;;  %v17_v20 = vld [vmem:[%s281_s0 + $0x28] sm:$0xff] }
   0xa   :  { %118 = vmatpush.xpose.msra.mxu2 %v33_v2  ;;  %119 = vmatpush.xpose.msra.mxu3 %v33_v2  ;;  %v12_v18 = vld [vmem:[%s281_s0] sm:$0xff]  ;;  %v14_v19 = vld [vmem:[%s281_s0 + $0x10] sm:$0xff]  ;;  %v19_v21 = vld [vmem:[%s281_s0 + $0x38] sm:$0xff] }
   0xb   :  { %38 = vmatpush.xpose.msra.mxu0 %v33_v2  ;;  %117 = vmatpush.xpose.msra.mxu1 %v33_v2  ;;  %v13_v22 = vld [vmem:[%s281_s0 + $0x8] sm:$0xff]  ;;  %v15_v23 = vld [vmem:[%s281_s0 + $0x18] sm:$0xff]  ;;  %s188_s0 = smov [#allocation2]  }
   0xc   :  { %s97_s28 = sshll.u32 %s188_s0, 4  ;;  %s98_s28 = int_to_ptr.vmem [resolvable:$true] %s97_s28 }
   0xe   :  { %121 = vmatpush.xpose.msra.mxu2 %v32_v3  ;;  %122 = vmatpush.xpose.msra.mxu3 %v32_v3 }
   0xf   :  { %39 = vmatpush.xpose.msra.mxu0 %v32_v3  ;;  %120 = vmatpush.xpose.msra.mxu1 %v32_v3 }
  0x12   :  { %124 = vmatpush.xpose.msra.mxu2 %v31_v4  ;;  %125 = vmatpush.xpose.msra.mxu3 %v31_v4 }
  0x13   :  { %40 = vmatpush.xpose.msra.mxu0 %v31_v4  ;;  %123 = vmatpush.xpose.msra.mxu1 %v31_v4 }
  0x16   :  { %127 = vmatpush.xpose.msra.mxu2 %v30_v5  ;;  %128 = vmatpush.xpose.msra.mxu3 %v30_v5 }
  0x17   :  { %41 = vmatpush.xpose.msra.mxu0 %v30_v5  ;;  %126 = vmatpush.xpose.msra.mxu1 %v30_v5 }
  0x1a   :  { %130 = vmatpush.xpose.msra.mxu2 %v29_v6  ;;  %131 = vmatpush.xpose.msra.mxu3 %v29_v6 }
  0x1b   :  { %42 = vmatpush.xpose.msra.mxu0 %v29_v6  ;;  %129 = vmatpush.xpose.msra.mxu1 %v29_v6 }
  0x1e   :  { %133 = vmatpush.xpose.msra.mxu2 %v28_v7  ;;  %134 = vmatpush.xpose.msra.mxu3 %v28_v7 }
  0x1f   :  { %43 = vmatpush.xpose.msra.mxu0 %v28_v7  ;;  %132 = vmatpush.xpose.msra.mxu1 %v28_v7 }
  0x22   :  { %136 = vmatpush.xpose.msra.mxu2 %v27_v8  ;;  %137 = vmatpush.xpose.msra.mxu3 %v27_v8 }
  0x23   :  { %44 = vmatpush.xpose.msra.mxu0 %v27_v8  ;;  %135 = vmatpush.xpose.msra.mxu1 %v27_v8 }
  0x26   :  { %139 = vmatpush.xpose.msra.mxu2 %v26_v9  ;;  %140 = vmatpush.xpose.msra.mxu3 %v26_v9 }
  0x27   :  { %45 = vmatpush.xpose.msra.mxu0 %v26_v9  ;;  %138 = vmatpush.xpose.msra.mxu1 %v26_v9 }
  0x2a   :  { %142 = vmatpush.xpose.msra.mxu2 %v25_v10  ;;  %143 = vmatpush.xpose.msra.mxu3 %v25_v10 }
  0x2b   :  { %46 = vmatpush.xpose.msra.mxu0 %v25_v10  ;;  %141 = vmatpush.xpose.msra.mxu1 %v25_v10 }
  0x2e   :  { %145 = vmatpush.xpose.msra.mxu2 %v24_v11  ;;  %146 = vmatpush.xpose.msra.mxu3 %v24_v11 }
  0x2f   :  { %47 = vmatpush.xpose.msra.mxu0 %v24_v11  ;;  %144 = vmatpush.xpose.msra.mxu1 %v24_v11 }
  0x32   :  { %148 = vmatpush.xpose.msra.mxu2 %v23_v12  ;;  %149 = vmatpush.xpose.msra.mxu3 %v23_v12 }
  0x33   :  { %48 = vmatpush.xpose.msra.mxu0 %v23_v12  ;;  %147 = vmatpush.xpose.msra.mxu1 %v23_v12 }
  0x36   :  { %151 = vmatpush.xpose.msra.mxu2 %v22_v13  ;;  %152 = vmatpush.xpose.msra.mxu3 %v22_v13 }
  0x37   :  { %49 = vmatpush.xpose.msra.mxu0 %v22_v13  ;;  %150 = vmatpush.xpose.msra.mxu1 %v22_v13 }
  0x3a   :  { %154 = vmatpush.xpose.msra.mxu2 %v21_v14  ;;  %155 = vmatpush.xpose.msra.mxu3 %v21_v14 }
  0x3b   :  { %50 = vmatpush.xpose.msra.mxu0 %v21_v14  ;;  %153 = vmatpush.xpose.msra.mxu1 %v21_v14 }
  0x3e   :  { %157 = vmatpush.xpose.msra.mxu2 %v20_v15  ;;  %158 = vmatpush.xpose.msra.mxu3 %v20_v15 }
  0x3f   :  { %51 = vmatpush.xpose.msra.mxu0 %v20_v15  ;;  %156 = vmatpush.xpose.msra.mxu1 %v20_v15 }
  0x41   :  { %64 = vmatmul.f32.vlgmr.msra.gmra.mxu2 %v16_v16  ;;  %70 = vmatmul.f32.vlgmr.msra.gmra.mxu3 %v18_v17 }
  0x42   :  { %52 = vmatmul.f32.vlgmr.msra.gmra.mxu0 %v12_v18  ;;  %58 = vmatmul.f32.vlgmr.msra.gmra.mxu1 %v14_v19 }
  0x49   :  { %67 = vmatmul.f32.gmra.mxu2 %v17_v20  ;;  %73 = vmatmul.f32.gmra.mxu3 %v19_v21 }
  0x4a   :  { %55 = vmatmul.f32.gmra.mxu0 %v13_v22  ;;  %61 = vmatmul.f32.gmra.mxu1 %v15_v23 }
  0xbf   :  { %v53_v24 = vpop.f32.mrf.mxu0  ;;  %v59_v25 = vpop.f32.mrf.mxu1 }
  0xc0   :  { %v77_v26 = vmax.f32 %v53_v24, 0.0  ;;  %v79_v27 = vmax.f32 %v59_v25, 0.0 }
  0xc2   :  { %85 = vst [vmem:[#allocation2] sm:$0xff] %v77_v26 }
  0xc3   :  { %87 = vst [vmem:[#allocation2 + $0x10] sm:$0xff] %v79_v27 }
  0xc4   :  { %v65_v28 = vpop.f32.mrf.mxu2  ;;  %v71_v29 = vpop.f32.mrf.mxu3 }
  0xc5   :  { %v81_v30 = vmax.f32 %v65_v28, 0.0  ;;  %v83_v31 = vmax.f32 %v71_v29, 0.0 }
  0xc7   :  { %89 = vst [vmem:[#allocation2 + $0x20] sm:$0xff] %v81_v30  ;;  %v56_v32 = vpop.f32.mrf.mxu0  ;;  %v62_v33 = vpop.f32.mrf.mxu1 }
  0xc8   :  { %91 = vst [vmem:[#allocation2 + $0x30] sm:$0xff] %v83_v31  ;;  %v78_v34 = vmax.f32 %v56_v32, 0.0  ;;  %v80_v35 = vmax.f32 %v62_v33, 0.0 }
  0xca   :  { %86 = vst [vmem:[#allocation2 + $0x8] sm:$0xff] %v78_v34 }
  0xcb   :  { %88 = vst [vmem:[#allocation2 + $0x18] sm:$0xff] %v80_v35 }
  0xcc   :  { %v68_v36 = vpop.f32.mrf.mxu2  ;;  %v74_v37 = vpop.f32.mrf.mxu3 }
  0xcd   :  { %v82_v38 = vmax.f32 %v68_v36, 0.0  ;;  %v84_v39 = vmax.f32 %v74_v37, 0.0 }
  0xcf   :  { %90 = vst [vmem:[#allocation2 + $0x28] sm:$0xff] %v82_v38 }
  0xd0   :  { %92 = vst [vmem:[#allocation2 + $0x38] sm:$0xff] %v84_v39 }
  0xd1   :  { %105 = dma.vmem_to_hbm [thread:$0]  %s98_s28, 1024, %s100_s3, [#allocation3], %s189_s4, %s189_s4, %s190_s5  }
  0xd2   :  { %186 = dma.done.wait [#allocation3], 1024  }
  0xd3   :  { %187 = vsyncadd [#allocation3], 4294966272 }
  0xd4   :  { %110 = vsyncpa [#allocation3], 1 }

</bundles_post_ra>
